<compile_context>
chip_gen: v7x
topology: tpu7x:2x2x1
jax: 0.10.0
libtpu: 0.0.40
codegen_flags: <defaults>
</compile_context>

<pallas_src>
import math

import jax
import jax.numpy as jnp
from jax import lax
from jax.experimental import pallas as pl
from jax.experimental.pallas import tpu as pltpu


def _discriminant_kernel(z_ref, w_ref, out_ref, jl_ref):
    w = w_ref[...]

    # Linear layer: out = z @ W^T.  Contract z's last axis with W's last axis
    # (nn.Linear semantics) so the MXU ingests W without a wrapper transpose.
    out_ref[...] = lax.dot_general(
        z_ref[...],
        w,
        dimension_numbers=(((1,), (1,)), ((), ())),
        preferred_element_type=jnp.float32,
    ).astype(out_ref.dtype)

    # Asymmetry penalty j_l = sum((W - W^T)^2), accumulated in f32.
    # Recomputed every grid step with the resident W (identical value each time), so
    # the result stays correct even when the batch axis is sharded across
    # TensorCores; the transpose goes to the XLU and the reduce to the VPU, which
    # are different bundle slots from the MXU matmul above.
    wf = w.astype(jnp.float32)
    d = wf - wf.T
    jl_ref[0, 0] = jnp.sum(d * d)


def _vmem_limit_bytes():
    # ~3/4 of physical per-core VMEM: ~48 MiB on v7x (64 MiB/TC), 96 MiB on v5e/v6e.
    try:
        cap = int(getattr(pltpu.get_tpu_info(), "vmem_capacity_bytes",
                          64 * 1024 * 1024))
    except Exception:
        cap = 64 * 1024 * 1024
    return min((cap * 3) // 4, 96 * 1024 * 1024)


def _pick_batch_tile(b, c, itemsize, vmem_limit):
    """Largest batch tile whose pipelined working set fits the VMEM budget."""
    w_bytes = c * c * itemsize
    headroom = 2 * 1024 * 1024            # Mosaic internal scratch, semaphores, ...
    per_row = 4 * c * itemsize            # z + out tiles, double-buffered each
    avail = vmem_limit - w_bytes - headroom
    tb_cap = max(avail // per_row, 8)
    if b <= tb_cap:
        tb = b                            # whole batch in a single grid step
    elif tb_cap >= 512:
        tb = min((tb_cap // 512) * 512, 2048)   # diminishing returns past ~2K rows
    else:
        tb = max((tb_cap // 8) * 8, 8)
    # v7x: when compute-bound (large C) make sure the "parallel" batch axis has at
    # least two steps so the second TensorCore is not idle (skip for mem-bound
    # shapes where the extra grid step is pure overhead).
    if tb >= b and c >= 1024 and b >= 256:
        tb = (((b + 1) // 2) + 7) // 8 * 8
    return int(tb)


def discriminant(z: jax.Array, weight: jax.Array):
    """Pallas equivalent of Discriminant.forward.

    Args:
      z:      (batch, C) float32
      weight: (C, C) float32, PyTorch Linear layout (out_features, in_features)

    Returns:
      (out, j_l): out is (batch, C); j_l is a scalar ().
    """
    b, c = z.shape
    assert weight.shape == (c, c)

    itemsize = jnp.dtype(z.dtype).itemsize
    vmem_limit = _vmem_limit_bytes()

    # TODO(synk): add an output-channel (N)-tiled path for C so large that the full
    # (C, C) weight no longer fits the VMEM budget (C >~ 3-4K f32 on v7x).
    if c * c * itemsize + 8 * 4 * c * itemsize + 2 * 1024 * 1024 > vmem_limit:
        raise NotImplementedError(
            "Discriminant Pallas kernel keeps the full (C, C) weight resident in "
            f"VMEM; C={c} exceeds the VMEM budget ({vmem_limit} bytes)."
        )

    tb = _pick_batch_tile(b, c, itemsize, vmem_limit)
    grid = (pl.cdiv(b, tb),)

    cost = pl.CostEstimate(
        flops=2 * b * c * c + 3 * c * c,
        transcendentals=0,
        bytes_accessed=(2 * b * c + c * c) * itemsize + 4,
    )

    out, jl = pl.pallas_call(
        _discriminant_kernel,
        out_shape=(
            jax.ShapeDtypeStruct((b, c), z.dtype),
            jax.ShapeDtypeStruct((1, 1), jnp.float32),
        ),
        grid=grid,
        in_specs=[
            pl.BlockSpec((tb, c), lambda i: (i, 0)),   # z tile, pipelined over batch
            pl.BlockSpec((c, c), lambda i: (0, 0)),    # W resident across all steps
        ],
        out_specs=(
            pl.BlockSpec((tb, c), lambda i: (i, 0)),                          # out
            pl.BlockSpec((1, 1), lambda i: (0, 0), memory_space=pltpu.SMEM),  # j_l
        ),
        compiler_params=pltpu.CompilerParams(
            dimension_semantics=("parallel",),   # shard batch tiles across TCs (v7x)
            vmem_limit_bytes=vmem_limit,
        ),
        cost_estimate=cost,
    )(z, weight)

    return out, jl[0, 0]


if __name__ == "__main__":
    key = jax.random.PRNGKey(0)
    k_z, k_w = jax.random.split(key)

    batch = 8
    out_channel = 32  # nn.Linear(out_channel, out_channel, bias=False)

    # Deterministic synthetic parameter init (PyTorch-style uniform bound 1/sqrt(fan_in)).
    bound = 1.0 / math.sqrt(out_channel)
    weight = jax.random.uniform(
        k_w, (out_channel, out_channel), dtype=jnp.float32,
        minval=-bound, maxval=bound,
    )
    z = jax.random.normal(k_z, (batch, out_channel), dtype=jnp.float32)

    out, j_l = discriminant(z, weight)
    jax.block_until_ready((out, j_l))

    # Lightweight correctness check against plain-JAX reference.
    out_ref = z @ weight.T
    jl_ref = jnp.sum(jnp.square(weight - weight.T))
    assert jnp.allclose(out, out_ref, atol=1e-5, rtol=1e-5)
    assert jnp.allclose(j_l, jl_ref, atol=1e-5, rtol=1e-5)

    print("KERNEL_OK")
</pallas_src>

<mosaic_0001>
module attributes {stable_mosaic.version = 11 : i64} {
  func.func @_discriminant_kernel(%arg0: i32, %arg1: memref<8x32xf32, #tpu.memory_space<vmem>>, %arg2: memref<32x32xf32, #tpu.memory_space<vmem>>, %arg3: memref<8x32xf32, #tpu.memory_space<vmem>>, %arg4: memref<1x1xf32, #tpu.memory_space<smem>>) attributes {dimension_semantics = [#tpu.dimension_semantics<parallel>], iteration_bounds = array<i64: 1>, scalar_prefetch = 0 : i64, scratch_operands = 0 : i64, tpu.core_type = #tpu.core_type<tc>, window_params = [{transform_indices = @transform_0, window_bounds = array<i64: 8, 32>}, {pipeline_mode = #tpu.pipeline_mode<synchronous>, transform_indices = @transform_1, window_bounds = array<i64: 32, 32>}, {transform_indices = @transform_2, window_bounds = array<i64: 8, 32>}, {transform_indices = @transform_3, window_bounds = array<i64: 1, 1>}]} {
    %c0 = arith.constant 0 : index
    %c0_0 = arith.constant 0 : index
    %0 = vector.load %arg2[%c0, %c0_0] : memref<32x32xf32, #tpu.memory_space<vmem>>, vector<32x32xf32>
    %c0_1 = arith.constant 0 : index
    %c0_2 = arith.constant 0 : index
    %1 = vector.load %arg1[%c0_1, %c0_2] : memref<8x32xf32, #tpu.memory_space<vmem>>, vector<8x32xf32>
    %cst = arith.constant dense<0.000000e+00> : vector<8x32xf32>
    %2 = tpu.matmul %1, %0, %cst {dimension_numbers = #tpu.dot_dimension_numbers<[1], [1], [0], [0], [0, 0, 1, 0], [], []>} : vector<8x32xf32>, vector<32x32xf32>, vector<8x32xf32> -> vector<8x32xf32>
    %c0_3 = arith.constant 0 : index
    %c0_4 = arith.constant 0 : index
    %3 = vector.load %arg3[%c0_3, %c0_4] : memref<8x32xf32, #tpu.memory_space<vmem>>, vector<8x32xf32>
    tpu.vector_store %arg3[%c0_3, %c0_4], %2 {strides = array<i32>} : memref<8x32xf32, #tpu.memory_space<vmem>>, vector<8x32xf32>,
    %4 = tpu.transpose %0, [1, 0] : vector<32x32xf32> -> vector<32x32xf32>
    %5 = arith.subf %0, %4 : vector<32x32xf32>
    %6 = arith.mulf %5, %5 : vector<32x32xf32>
    %7 = vector.shape_cast %6 : vector<32x32xf32> to vector<1x32x32xf32>
    %cst_5 = arith.constant dense<0.000000e+00> : vector<1xf32>
    %8 = vector.multi_reduction <add>, %7, %cst_5 [1, 2] : vector<1x32x32xf32> to vector<1xf32>
    %9 = vector.shape_cast %8 : vector<1xf32> to vector<1x1x1xf32>
    %10 = vector.extract %9[0, 0, 0] : f32 from vector<1x1x1xf32>
    %c0_6 = arith.constant 0 : index
    %c0_7 = arith.constant 0 : index
    %11 = memref.load %arg4[%c0_6, %c0_7] : memref<1x1xf32, #tpu.memory_space<smem>>
    memref.store %10, %arg4[%c0_6, %c0_7] : memref<1x1xf32, #tpu.memory_space<smem>>
    return
  }
  func.func @transform_0(%arg0: i32) -> (i32, i32) {
    %c0_i32 = arith.constant 0 : i32
    %c0_i32_0 = arith.constant 0 : i32
    return %arg0, %c0_i32 : i32, i32
  }
  func.func @transform_1(%arg0: i32) -> (i32, i32) {
    %c0_i32 = arith.constant 0 : i32
    %c0_i32_0 = arith.constant 0 : i32
    %c0_i32_1 = arith.constant 0 : i32
    return %c0_i32, %c0_i32_0 : i32, i32
  }
  func.func @transform_2(%arg0: i32) -> (i32, i32) {
    %c0_i32 = arith.constant 0 : i32
    %c0_i32_0 = arith.constant 0 : i32
    return %arg0, %c0_i32 : i32, i32
  }
  func.func @transform_3(%arg0: i32) -> (i32, i32) {
    %c0_i32 = arith.constant 0 : i32
    %c0_i32_0 = arith.constant 0 : i32
    %c0_i32_1 = arith.constant 0 : i32
    return %c0_i32, %c0_i32_0 : i32, i32
  }
}

</mosaic_0001>

<bundles_post_ra>
// kernel: tpu_custom_call.1
= control target key start
LH: loop header
LB: loop body
LE: loop exit
PB: predicated region body
PF: predicated region fallthrough
CT: control target
= control target key end

     0   :  { %9 = vsyncpa [#allocation3], 0  ;;  %s436_s0 = inlined_call_operand.hbm [shape: f32[8,32], index: 0, kind: input, shape index: {}]   ;;  %s437_s1 = inlined_call_operand.hbm [shape: f32[32,32], index: 1, kind: input, shape index: {}]   ;;  %s438_s2 = inlined_call_operand.hbm [shape: f32[8,32], index: 2, kind: output, shape index: {0}]   ;;  %s439_s3 = inlined_call_operand.hbm [shape: f32[1,1], index: 3, kind: output, shape index: {1}]  }
   0x1   :  { %10 = vsyncpa [#allocation7], 0 }
   0x2   :  { %11 = vsyncpa [#allocation4], 0 }
   0x3   :  { %12 = vsyncpa [#allocation5], 0  ;;  %s344_s12 = smov [#allocation2]   ;;  %s345_s14 = smov [#allocation6]  }
   0x4   :  { %s19_s13 = sshll.u32 %s344_s12, 4  ;;  %s28_s15 = sshll.u32 %s345_s14, 4  ;;  %s20_s13 = int_to_ptr.vmem [resolvable:$true] %s19_s13  ;;  %s373_s15 = int_to_ptr.vmem [resolvable:$true] %s28_s15 }
   0x5   :  { %s260_s18 = scalar_lea.hbm %s436_s0, 128 }
   0x6   :  { %p261_p0 = scmp.ne.s32.totalorder %s436_s0, %s260_s18  ;;  %p264_p1 = scmp.lt.u32.totalorder %s260_s18, %s436_s0 }
   0x8   :  { %p266_p2 = pnand %p264_p1, %p261_p0 }
   0xa   :  { %269 = shalt.err (!%p266_p2)
}
   0xb   :  { %s270_s23 = scalar_lea.vmem %s20_s13, 128  ;;  %p275_p4 = scmp.lt.s32.totalorder %s20_s13, %s20_s13 }
   0xc   :  { %p271_p3 = scmp.ne.s32.totalorder %s20_s13, %s270_s23  ;;  %p276_p5 = scmp.lt.s32.totalorder %s270_s23, %s270_s23 }
   0xe   :  { %p277_p6 = por %p276_p5, %p275_p4 }
  0x10   :  { %p278_p7 = pnand %p277_p6, %p271_p3 }
  0x12   :  { %281 = shalt.err (!%p278_p7)
}
  0x13   :  { %22 = dma.hbm_to_vmem [thread:$0]  %s436_s0, 128, %s20_s13, [#allocation3]  }
  0x14   :  { %s282_s28 = scalar_lea.hbm %s437_s1, 512 }
  0x15   :  { %p283_p8 = scmp.ne.s32.totalorder %s437_s1, %s282_s28  ;;  %p286_p9 = scmp.lt.u32.totalorder %s282_s28, %s437_s1 }
  0x17   :  { %p288_p10 = pnand %p286_p9, %p283_p8 }
  0x19   :  { %291 = shalt.err (!%p288_p10)
}
  0x1a   :  { %s292_s6 = scalar_lea.vmem %s373_s15, 512  ;;  %p297_p12 = scmp.lt.s32.totalorder %s373_s15, %s373_s15 }
  0x1b   :  { %p293_p11 = scmp.ne.s32.totalorder %s373_s15, %s292_s6  ;;  %p298_p13 = scmp.lt.s32.totalorder %s292_s6, %s292_s6 }
  0x1d   :  { %p299_p0 = por %p298_p13, %p297_p12 }
  0x1f   :  { %p300_p1 = pnand %p299_p0, %p293_p11 }
  0x21   :  { %303 = shalt.err (!%p300_p1)
}
  0x22   :  { %s346_s0 = smov 128   ;;  %s347_s7 = smov 8  }
  0x23   :  { %34 = dma.hbm_to_vmem [thread:$0]  %s437_s1, 512, %s373_s15, [#allocation7], %s346_s0, %s346_s0, %s347_s7  }
  0x24   :  { %336 = dma.done.wait [#allocation3], 128  }
  0x25   :  { %337 = vsyncadd [#allocation3], 4294967168 }
  0x26   :  { %338 = dma.done.wait [#allocation7], 512  }
  0x27   :  { %339 = vsyncadd [#allocation7], 4294966784  ;;  %v348_v0 = vmov 0.0|0.0   ;;  %vm46_vm0 = vcmask 261120   ;;  %v41_v1 = vld [vmem:[#allocation6] sm:$0xff]  ;;  %v42_v2 = vld [vmem:[#allocation6 + $0x8] sm:$0xff] }
  0x28   :  { %241 = vmatprep.subr.bf16.mxu0 %v348_v0  ;;  %vm243_vm1 = vmpackc.low %vm46_vm0, %vm46_vm0  ;;  %133 = vxpose.xlu0.b32.start [1/4] (short) (narrow) %v41_v1, 32  ;;  %v242_v3 = vpack.c.bf16 %v42_v2, %v41_v1  ;;  %v43_v4 = vld [vmem:[#allocation6 + $0x10] sm:$0xff]  ;;  %v44_v5 = vld [vmem:[#allocation6 + $0x18] sm:$0xff]  ;;  %vm349_vm2 = vmmov 0   ;;  %v350_v7 = vmov 0.0   ;;  %s351_s1 = smov [#allocation8]  }
  0x29   :  { %v246_v6 = vpack.c.bf16 %v44_v5, %v43_v4  ;;  %238 = vmatprep.mubr.msk.f32.mxu0 %vm349_vm2, %v350_v7  ;;  %v45_v8 = vld [vmem:[#allocation2] sm:$0xff]  ;;  %s197_s10 = sshll.u32 %s351_s1, 4  ;;  %s198_s10 = int_to_ptr.vmem [resolvable:$true] %s197_s10 }
  0x2a   :  { %244 = vmatpush3.bf16.xpose.msk.msra.mxu0 %vm243_vm1, %v242_v3  ;;  %s304_s11 = scalar_lea.vmem %s198_s10, 128  ;;  %p309_p3 = scmp.lt.s32.totalorder %s198_s10, %s198_s10 }
  0x2b   :  { %245 = vmatprep.subr.bf16.mxu0 %v348_v0  ;;  %p305_p2 = scmp.ne.s32.totalorder %s198_s10, %s304_s11  ;;  %p310_p4 = scmp.lt.s32.totalorder %s304_s11, %s304_s11 }
  0x2c   :  { %134 = vxpose.xlu0.b32.cont [2/4] (short) (narrow) %v42_v2, 32 }
  0x2d   :  { %p311_p5 = por %p310_p4, %p309_p3 }
  0x2f   :  { %p312_p6 = pnand %p311_p5, %p305_p2 }
  0x30   :  { %135 = vxpose.xlu0.b32.cont [3/4] (short) (narrow) %v43_v4, 32 }
  0x32   :  { %248 = vmatpush3.bf16.xpose.msk.msra.mxu0 %vm243_vm1, %v246_v6 }
  0x34   :  { %136 = vxpose.xlu0.b32.end [4/4] (short) (narrow) %v44_v5, 32 }
  0x39   :  { %239 = vmatmul.mubr.msk.f32.vlgmr.msra.gmra.mrb[0].mxu0 %vm46_vm0, %v45_v8 }
  0xa8   :  { %v149_v9 = vpop.trf.xlu0 }
  0xa9   :  { %v165_v11 = vsub.f32 %v41_v1, %v149_v9 }
  0xab   :  { %v169_v15 = vmul.f32 %v165_v11, %v165_v11 }
  0xac   :  { %v150_v10 = vpop.trf.xlu0 }
  0xad   :  { %v166_v12 = vsub.f32 %v42_v2, %v150_v10  ;;  %v173_v20 = vsel %vm46_vm0, %v169_v15, 0.0 }
  0xaf   :  { %v170_v13 = vmul.f32 %v166_v12, %v166_v12 }
  0xb0   :  { %v151_v14 = vpop.trf.xlu0 }
  0xb1   :  { %v167_v16 = vsub.f32 %v43_v4, %v151_v14  ;;  %v174_v17 = vsel %vm46_vm0, %v170_v13, 0.0 }
  0xb2   :  { %v175_v23 = vadd.f32 %v174_v17, %v173_v20 }
  0xb3   :  { %v171_v18 = vmul.f32 %v167_v16, %v167_v16 }
  0xb4   :  { %v152_v19 = vpop.trf.xlu0 }
  0xb5   :  { %v168_v21 = vsub.f32 %v44_v5, %v152_v19  ;;  %v176_v22 = vsel %vm46_vm0, %v171_v18, 0.0 }
  0xb6   :  { %v177_v25 = vadd.f32 %v176_v22, %v175_v23 }
  0xb7   :  { %v172_v24 = vmul.f32 %v168_v21, %v168_v21 }
  0xb9   :  { %v178_v26 = vsel %vm46_vm0, %v172_v24, 0.0 }
  0xba   :  { %v179_v27 = vadd.f32 %v178_v26, %v177_v25 }
  0xbc   :  { %180 = vadd.xlane.f32.xlu1 %v179_v27 }
 0x10c   :  { %v128_v28 = vpop.f32.mrb[0].mxu0 }
 0x10d   :  { %132 = vst.msk [vmem:[#allocation8] sm:$0xff] %vm46_vm0, %v128_v28  ;;  %v240_v29 = vpop.f32.mrb[1].mxu0 }
 0x10e   :  { %315 = shalt.err (!%p312_p6)
}
 0x10f   :  { %s316_s14 = scalar_lea.hbm %s438_s2, 128 }
 0x110   :  { %p317_p7 = scmp.ne.s32.totalorder %s438_s2, %s316_s14  ;;  %p320_p8 = scmp.lt.u32.totalorder %s316_s14, %s438_s2 }
 0x112   :  { %p322_p9 = pnand %p320_p8, %p317_p7 }
 0x114   :  { %325 = shalt.err (!%p322_p9)
}
 0x115   :  { %200 = dma.vmem_to_hbm [thread:$0]  %s198_s10, 128, %s438_s2, [#allocation4]  }
 0x116   :  { %s326_s24 = scalar_lea.hbm %s439_s3, 16 }
 0x117   :  { %p327_p10 = scmp.ne.s32.totalorder %s439_s3, %s326_s24  ;;  %p330_p11 = scmp.lt.u32.totalorder %s326_s24, %s439_s3 }
 0x119   :  { %p332_p12 = pnand %p330_p11, %p327_p10 }
 0x149   :  { %v181_v30 = vpop.xlane.xlu1 %180 }
 0x14a   :  { %v182_v31 = vrot.slane %v181_v30, 4 }
 0x14c   :  { %v183_v32 = vadd.f32 %v182_v31, %v181_v30 }
 0x14e   :  { %v184_v33 = vrot.slane %v183_v32, 2 }
 0x150   :  { %v185_v34 = vadd.f32 %v184_v33, %v183_v32 }
 0x152   :  { %v186_v35 = vrot.slane %v185_v34, 1 }
 0x154   :  { %v187_v36 = vadd.f32 %v186_v35, %v185_v34 }
 0x156   :  { %249 = vpush %v187_v36 }
 0x187   :  { %s250_s21 = spop %249 }
 0x188   :  { %190 = sst [smem:[#allocation9]] %s250_s21 }
 0x189   :  { %335 = shalt.err (!%p332_p12)
}
 0x18a   :  { %s352_s28 = smov [#allocation9]  }
 0x18b   :  { %208 = dma.smem_to_hbm %s352_s28, 16, %s439_s3, [#allocation5]  }
 0x18c   :  { %340 = dma.done.wait [#allocation4], 128  }
 0x18d   :  { %341 = vsyncadd [#allocation4], 4294967168 }
 0x18e   :  { %342 = dma.done.wait [#allocation5], 16  }
 0x18f   :  { %343 = vsyncadd [#allocation5], 4294967280 }
 0x190   :  { %215 = sfence }
 0x191   :  { %216 = vsyncpa [#allocation3], 1 }
 0x192   :  { %217 = vsyncpa [#allocation7], 1 }
 0x193   :  { %218 = vsyncpa [#allocation4], 1 }
 0x194   :  { %219 = vsyncpa [#allocation5], 1 }

</bundles_post_ra>
